<compile_context>
chip_gen: v5e
topology: v5e:2x2
jax: 0.10.0
libtpu: 0.0.40
codegen_flags: <defaults>
</compile_context>

<pallas_src>
import jax
import jax.numpy as jnp
from jax import lax
from jax.experimental import pallas as pl
from jax.experimental.pallas import tpu as pltpu


def lstm_classifier_kernel(
    x_ref,      # (S, D_in)      input sentence
    wf_ref,     # (D_in, 4H)     fused (embedding -> gates) input weight
    wp_ref,     # (H, 4H + L)    [ W_hh^T | W_end^T ] packed
    bp_ref,     # (1, 4H + L)    [ b_fused | b_end ] packed
    out_ref,    # (1, L)         log-probs output
    pg_ref,     # scratch VMEM (S, 4H): input-side pre-gates for all steps
):
    S = x_ref.shape[0]
    H = wp_ref.shape[0]
    G = 4 * H
    L = out_ref.shape[1]

    # --- input-side pre-gates for every timestep in a single MXU call ---
    #   pre_gates = x @ W_fused + b_fused            # (S, 4H)
    pg_ref[...] = (
        jnp.dot(x_ref[...], wf_ref[...], preferred_element_type=jnp.float32)
        + bp_ref[:, :G]
    )

    # Loop-invariant operands: read once, keep in vregs across the loop.
    whh = wp_ref[:, :G]            # (H, 4H) recurrent weight
    wend = wp_ref[:, G:G + L]      # (H, L)  output head weight
    bend = bp_ref[:, G:G + L]      # (1, L)  output head bias

    # Lane mask selecting the g-gate (tanh) lanes of the [i|f|g|o] row.
    lane = lax.broadcasted_iota(jnp.int32, (1, G), 1)
    g_lanes = (lane >= 2 * H) & (lane < 3 * H)

    h0 = jnp.zeros((1, H), jnp.float32)
    c0 = jnp.zeros((1, H), jnp.float32)

    def step(t, carry):
        h, c = carry
        gates = pg_ref[pl.ds(t, 1), :] + jnp.dot(
            h, whh, preferred_element_type=jnp.float32
        )                                                   # (1, 4H)
        # Activate the whole row once (2 full-width EUP ops), then slice.
        act = jnp.where(g_lanes, jnp.tanh(gates), jax.nn.sigmoid(gates))
        i_g = act[:, 0 * H:1 * H]
        f_g = act[:, 1 * H:2 * H]
        g_g = act[:, 2 * H:3 * H]
        o_g = act[:, 3 * H:4 * H]
        c_new = f_g * c + i_g * g_g
        h_new = o_g * jnp.tanh(c_new)
        return (h_new, c_new)

    # S is static and small: full unroll keeps the recurrence visible to the
    # scheduler so MXU pop latency hides under adjacent steps' EUP/VALU work.
    h_final, _ = lax.fori_loop(0, S, step, (h0, c0), unroll=True)

    # --- output head + log_softmax over the label dim ---
    y = jnp.dot(h_final, wend, preferred_element_type=jnp.float32) + bend
    m = jnp.max(y, axis=-1, keepdims=True)
    lse = m + jnp.log(jnp.sum(jnp.exp(y - m), axis=-1, keepdims=True))
    out_ref[...] = y - lse
    # TODO(synk): batch>1 throughput variant (grid over batch, "parallel"
    # axis for v7x's two TensorCores) is out of scope for this batch-1 module.


def lstm_classifier_forward(sentence, packed):
    """sentence: (S, D_in) float32; packed = (w_fused, w_pack, b_pack).

    Returns (1, label_size) log-probs.
    """
    w_fused, w_pack, b_pack = packed
    S = sentence.shape[0]
    H = w_pack.shape[0]
    G = 4 * H
    L = w_pack.shape[1] - G

    vmem = pl.BlockSpec(memory_space=pltpu.MemorySpace.VMEM)
    return pl.pallas_call(
        lstm_classifier_kernel,
        out_shape=jax.ShapeDtypeStruct((1, L), jnp.float32),
        in_specs=[vmem, vmem, vmem, vmem],
        out_specs=vmem,
        scratch_shapes=[pltpu.VMEM((S, G), jnp.float32)],
    )(sentence, w_fused, w_pack, b_pack)


def make_raw_params(key, input_dim, embedding_dim, hidden_dim, label_size):
    """Deterministic synthetic parameters in PyTorch layout (not a checkpoint)."""
    ks = jax.random.split(key, 8)
    s = 0.1
    w_emb = s * jax.random.normal(ks[0], (embedding_dim, input_dim), jnp.float32)
    b_emb = s * jax.random.normal(ks[1], (embedding_dim,), jnp.float32)
    w_ih = s * jax.random.normal(ks[2], (4 * hidden_dim, embedding_dim), jnp.float32)
    w_hh = s * jax.random.normal(ks[3], (4 * hidden_dim, hidden_dim), jnp.float32)
    b_ih = s * jax.random.normal(ks[4], (4 * hidden_dim,), jnp.float32)
    b_hh = s * jax.random.normal(ks[5], (4 * hidden_dim,), jnp.float32)
    w_end = s * jax.random.normal(ks[6], (label_size, hidden_dim), jnp.float32)
    b_end = s * jax.random.normal(ks[7], (label_size,), jnp.float32)
    # NOTE: hidden2label_start exists in __init__ but is unused in forward().
    return (w_emb, b_emb, w_ih, w_hh, b_ih, b_hh, w_end, b_end)


def pack_params(raw):
    """Host-side algebra: fold the embedding Linear into the LSTM input
    weight and pack the remaining operands into two slabs (fewer DMAs)."""
    w_emb, b_emb, w_ih, w_hh, b_ih, b_hh, w_end, b_end = raw
    we_t = w_emb.T                                   # (D_in, E)
    wih_t = w_ih.T                                   # (E, 4H)
    hp = lax.Precision.HIGHEST
    w_fused = jnp.dot(we_t, wih_t, precision=hp)     # (D_in, 4H)
    b_fused = jnp.dot(b_emb, wih_t, precision=hp) + b_ih + b_hh      # (4H,)
    w_pack = jnp.concatenate([w_hh.T, w_end.T], axis=1)              # (H, 4H+L)
    b_pack = jnp.concatenate([b_fused, b_end]).reshape(1, -1)        # (1, 4H+L)
    return (w_fused, w_pack, b_pack)


def reference_forward(sentence, raw):
    """Pure-JAX reference mirroring the PyTorch module structure."""
    w_emb, b_emb, w_ih, w_hh, b_ih, b_hh, w_end, b_end = raw
    H = w_hh.shape[1]
    emb = sentence @ w_emb.T + b_emb
    h = jnp.zeros((1, H), jnp.float32)
    c = jnp.zeros((1, H), jnp.float32)
    for t in range(sentence.shape[0]):
        gates = emb[t:t + 1] @ w_ih.T + h @ w_hh.T + b_ih + b_hh
        i_g = jax.nn.sigmoid(gates[:, 0 * H:1 * H])
        f_g = jax.nn.sigmoid(gates[:, 1 * H:2 * H])
        g_g = jnp.tanh(gates[:, 2 * H:3 * H])
        o_g = jax.nn.sigmoid(gates[:, 3 * H:4 * H])
        c = f_g * c + i_g * g_g
        h = o_g * jnp.tanh(c)
    y = h @ w_end.T + b_end
    return jax.nn.log_softmax(y, axis=-1)


if __name__ == "__main__":
    # Small shapes consistent with the module's forward pass (batch = 1).
    seq_len, input_dim, embedding_dim, hidden_dim, label_size = 8, 16, 32, 32, 8

    key = jax.random.PRNGKey(0)
    k_x, k_p = jax.random.split(key)
    sentence = jax.random.normal(k_x, (seq_len, input_dim), jnp.float32)
    raw = make_raw_params(k_p, input_dim, embedding_dim, hidden_dim, label_size)
    packed = pack_params(raw)

    log_probs = lstm_classifier_forward(sentence, packed)
    log_probs = jax.block_until_ready(log_probs)

    ref = reference_forward(sentence, raw)
    assert log_probs.shape == (1, label_size)
    # Slightly looser tolerance than exact: folding the embedding into the
    # input-gate weight re-associates a matmul (x @ (We Wih) vs (x We) Wih).
    assert jnp.allclose(log_probs, ref, rtol=2e-3, atol=2e-3), (
        jnp.max(jnp.abs(log_probs - ref))
    )

    print("KERNEL_OK")
</pallas_src>

<mosaic_0001>
module attributes {stable_mosaic.version = 11 : i64} {
  func.func @lstm_classifier_kernel(%arg0: memref<8x16xf32, #tpu.memory_space<vmem>>, %arg1: memref<16x128xf32, #tpu.memory_space<vmem>>, %arg2: memref<32x136xf32, #tpu.memory_space<vmem>>, %arg3: memref<1x136xf32, #tpu.memory_space<vmem>>, %arg4: memref<1x8xf32, #tpu.memory_space<vmem>>, %arg5: memref<8x128xf32, #tpu.memory_space<vmem>>) attributes {dimension_semantics = [], scalar_prefetch = 0 : i64, scratch_operands = 1 : i64, tpu.core_type = #tpu.core_type<tc>} {
    %c0 = arith.constant 0 : index
    %c0_0 = arith.constant 0 : index
    %0 = vector.load %arg0[%c0, %c0_0] : memref<8x16xf32, #tpu.memory_space<vmem>>, vector<8x16xf32>
    %c0_1 = arith.constant 0 : index
    %c0_2 = arith.constant 0 : index
    %1 = vector.load %arg1[%c0_1, %c0_2] : memref<16x128xf32, #tpu.memory_space<vmem>>, vector<16x128xf32>
    %cst = arith.constant dense<0.000000e+00> : vector<8x128xf32>
    %2 = tpu.matmul %0, %1, %cst {dimension_numbers = #tpu.dot_dimension_numbers<[1], [0], [0], [1], [0, 0, 1, 1], [], []>} : vector<8x16xf32>, vector<16x128xf32>, vector<8x128xf32> -> vector<8x128xf32>
    %c0_3 = arith.constant 0 : index
    %c0_4 = arith.constant 0 : index
    %3 = vector.load %arg3[%c0_3, %c0_4] : memref<1x136xf32, #tpu.memory_space<vmem>>, vector<1x128xf32>
    %4 = vector.broadcast %3 : vector<1x128xf32> to vector<8x128xf32>
    %5 = arith.addf %2, %4 : vector<8x128xf32>
    %c0_5 = arith.constant 0 : index
    %c0_6 = arith.constant 0 : index
    %6 = vector.load %arg5[%c0_5, %c0_6] : memref<8x128xf32, #tpu.memory_space<vmem>>, vector<8x128xf32>
    tpu.vector_store %arg5[%c0_5, %c0_6], %5 {strides = array<i32>} : memref<8x128xf32, #tpu.memory_space<vmem>>, vector<8x128xf32>,
    %c0_7 = arith.constant 0 : index
    %c0_8 = arith.constant 0 : index
    %7 = vector.load %arg2[%c0_7, %c0_8] : memref<32x136xf32, #tpu.memory_space<vmem>>, vector<32x128xf32>
    %c0_9 = arith.constant 0 : index
    %c128 = arith.constant 128 : index
    %8 = vector.load %arg2[%c0_9, %c128] : memref<32x136xf32, #tpu.memory_space<vmem>>, vector<32x8xf32>
    %c0_10 = arith.constant 0 : index
    %c128_11 = arith.constant 128 : index
    %9 = vector.load %arg3[%c0_10, %c128_11] : memref<1x136xf32, #tpu.memory_space<vmem>>, vector<1x8xf32>
    %10 = tpu.iota {dimensions = array<i32: 1>} : vector<1x128xi32>
    %c64_i32 = arith.constant 64 : i32
    %11 = vector.broadcast %c64_i32 : i32 to vector<1x128xi32>
    %12 = arith.cmpi sge, %10, %11 : vector<1x128xi32>
    %c96_i32 = arith.constant 96 : i32
    %13 = vector.broadcast %c96_i32 : i32 to vector<1x128xi32>
    %14 = arith.cmpi slt, %10, %13 : vector<1x128xi32>
    %15 = arith.andi %12, %14 : vector<1x128xi1>
    %cst_12 = arith.constant 0.000000e+00 : f32
    %16 = vector.broadcast %cst_12 : f32 to vector<1x32xf32>
    %cst_13 = arith.constant 0.000000e+00 : f32
    %17 = vector.broadcast %cst_13 : f32 to vector<1x32xf32>
    %c0_i32 = arith.constant 0 : i32
    %18 = arith.index_cast %c0_i32 : i32 to index
    %c0_14 = arith.constant 0 : index
    %19 = vector.load %arg5[%18, %c0_14] : memref<8x128xf32, #tpu.memory_space<vmem>>, vector<1x128xf32>
    %cst_15 = arith.constant dense<0.000000e+00> : vector<1x128xf32>
    %20 = tpu.matmul %16, %7, %cst_15 {dimension_numbers = #tpu.dot_dimension_numbers<[1], [0], [0], [1], [0, 0, 1, 1], [], []>} : vector<1x32xf32>, vector<32x128xf32>, vector<1x128xf32> -> vector<1x128xf32>
    %21 = arith.addf %19, %20 : vector<1x128xf32>
    %22 = math.tanh %21 : vector<1x128xf32>
    %23 = arith.negf %21 : vector<1x128xf32>
    %24 = math.exp %23 : vector<1x128xf32>
    %cst_16 = arith.constant 1.000000e+00 : f32
    %25 = vector.broadcast %cst_16 : f32 to vector<1x128xf32>
    %26 = arith.addf %25, %24 : vector<1x128xf32>
    %27 = arith.divf %25, %26 : vector<1x128xf32>
    %28 = arith.select %15, %22, %27 : vector<1x128xi1>, vector<1x128xf32>
    %29 = vector.extract_strided_slice %28 {offsets = [0, 0], sizes = [1, 32], strides = [1, 1]} : vector<1x128xf32> to vector<1x32xf32>
    %30 = vector.extract_strided_slice %28 {offsets = [0, 32], sizes = [1, 32], strides = [1, 1]} : vector<1x128xf32> to vector<1x32xf32>
    %31 = vector.extract_strided_slice %28 {offsets = [0, 64], sizes = [1, 32], strides = [1, 1]} : vector<1x128xf32> to vector<1x32xf32>
    %32 = vector.extract_strided_slice %28 {offsets = [0, 96], sizes = [1, 32], strides = [1, 1]} : vector<1x128xf32> to vector<1x32xf32>
    %33 = arith.mulf %30, %17 : vector<1x32xf32>
    %34 = arith.mulf %29, %31 : vector<1x32xf32>
    %35 = arith.addf %33, %34 : vector<1x32xf32>
    %36 = math.tanh %35 : vector<1x32xf32>
    %37 = arith.mulf %32, %36 : vector<1x32xf32>
    %c1_i32 = arith.constant 1 : i32
    %38 = arith.index_cast %c1_i32 : i32 to index
    %c0_17 = arith.constant 0 : index
    %39 = vector.load %arg5[%38, %c0_17] : memref<8x128xf32, #tpu.memory_space<vmem>>, vector<1x128xf32>
    %cst_18 = arith.constant dense<0.000000e+00> : vector<1x128xf32>
    %40 = tpu.matmul %37, %7, %cst_18 {dimension_numbers = #tpu.dot_dimension_numbers<[1], [0], [0], [1], [0, 0, 1, 1], [], []>} : vector<1x32xf32>, vector<32x128xf32>, vector<1x128xf32> -> vector<1x128xf32>
    %41 = arith.addf %39, %40 : vector<1x128xf32>
    %42 = math.tanh %41 : vector<1x128xf32>
    %43 = arith.negf %41 : vector<1x128xf32>
    %44 = math.exp %43 : vector<1x128xf32>
    %cst_19 = arith.constant 1.000000e+00 : f32
    %45 = vector.broadcast %cst_19 : f32 to vector<1x128xf32>
    %46 = arith.addf %45, %44 : vector<1x128xf32>
    %47 = arith.divf %45, %46 : vector<1x128xf32>
    %48 = arith.select %15, %42, %47 : vector<1x128xi1>, vector<1x128xf32>
    %49 = vector.extract_strided_slice %48 {offsets = [0, 0], sizes = [1, 32], strides = [1, 1]} : vector<1x128xf32> to vector<1x32xf32>
    %50 = vector.extract_strided_slice %48 {offsets = [0, 32], sizes = [1, 32], strides = [1, 1]} : vector<1x128xf32> to vector<1x32xf32>
    %51 = vector.extract_strided_slice %48 {offsets = [0, 64], sizes = [1, 32], strides = [1, 1]} : vector<1x128xf32> to vector<1x32xf32>
    %52 = vector.extract_strided_slice %48 {offsets = [0, 96], sizes = [1, 32], strides = [1, 1]} : vector<1x128xf32> to vector<1x32xf32>
    %53 = arith.mulf %50, %35 : vector<1x32xf32>
    %54 = arith.mulf %49, %51 : vector<1x32xf32>
    %55 = arith.addf %53, %54 : vector<1x32xf32>
    %56 = math.tanh %55 : vector<1x32xf32>
    %57 = arith.mulf %52, %56 : vector<1x32xf32>
    %c2_i32 = arith.constant 2 : i32
    %58 = arith.index_cast %c2_i32 : i32 to index
    %c0_20 = arith.constant 0 : index
    %59 = vector.load %arg5[%58, %c0_20] : memref<8x128xf32, #tpu.memory_space<vmem>>, vector<1x128xf32>
    %cst_21 = arith.constant dense<0.000000e+00> : vector<1x128xf32>
    %60 = tpu.matmul %57, %7, %cst_21 {dimension_numbers = #tpu.dot_dimension_numbers<[1], [0], [0], [1], [0, 0, 1, 1], [], []>} : vector<1x32xf32>, vector<32x128xf32>, vector<1x128xf32> -> vector<1x128xf32>
    %61 = arith.addf %59, %60 : vector<1x128xf32>
    %62 = math.tanh %61 : vector<1x128xf32>
    %63 = arith.negf %61 : vector<1x128xf32>
    %64 = math.exp %63 : vector<1x128xf32>
    %cst_22 = arith.constant 1.000000e+00 : f32
    %65 = vector.broadcast %cst_22 : f32 to vector<1x128xf32>
    %66 = arith.addf %65, %64 : vector<1x128xf32>
    %67 = arith.divf %65, %66 : vector<1x128xf32>
    %68 = arith.select %15, %62, %67 : vector<1x128xi1>, vector<1x128xf32>
    %69 = vector.extract_strided_slice %68 {offsets = [0, 0], sizes = [1, 32], strides = [1, 1]} : vector<1x128xf32> to vector<1x32xf32>
    %70 = vector.extract_strided_slice %68 {offsets = [0, 32], sizes = [1, 32], strides = [1, 1]} : vector<1x128xf32> to vector<1x32xf32>
    %71 = vector.extract_strided_slice %68 {offsets = [0, 64], sizes = [1, 32], strides = [1, 1]} : vector<1x128xf32> to vector<1x32xf32>
    %72 = vector.extract_strided_slice %68 {offsets = [0, 96], sizes = [1, 32], strides = [1, 1]} : vector<1x128xf32> to vector<1x32xf32>
    %73 = arith.mulf %70, %55 : vector<1x32xf32>
    %74 = arith.mulf %69, %71 : vector<1x32xf32>
    %75 = arith.addf %73, %74 : vector<1x32xf32>
    %76 = math.tanh %75 : vector<1x32xf32>
    %77 = arith.mulf %72, %76 : vector<1x32xf32>
    %c3_i32 = arith.constant 3 : i32
    %78 = arith.index_cast %c3_i32 : i32 to index
    %c0_23 = arith.constant 0 : index
    %79 = vector.load %arg5[%78, %c0_23] : memref<8x128xf32, #tpu.memory_space<vmem>>, vector<1x128xf32>
    %cst_24 = arith.constant dense<0.000000e+00> : vector<1x128xf32>
    %80 = tpu.matmul %77, %7, %cst_24 {dimension_numbers = #tpu.dot_dimension_numbers<[1], [0], [0], [1], [0, 0, 1, 1], [], []>} : vector<1x32xf32>, vector<32x128xf32>, vector<1x128xf32> -> vector<1x128xf32>
    %81 = arith.addf %79, %80 : vector<1x128xf32>
    %82 = math.tanh %81 : vector<1x128xf32>
    %83 = arith.negf %81 : vector<1x128xf32>
    %84 = math.exp %83 : vector<1x128xf32>
    %cst_25 = arith.constant 1.000000e+00 : f32
    %85 = vector.broadcast %cst_25 : f32 to vector<1x128xf32>
    %86 = arith.addf %85, %84 : vector<1x128xf32>
    %87 = arith.divf %85, %86 : vector<1x128xf32>
    %88 = arith.select %15, %82, %87 : vector<1x128xi1>, vector<1x128xf32>
    %89 = vector.extract_strided_slice %88 {offsets = [0, 0], sizes = [1, 32], strides = [1, 1]} : vector<1x128xf32> to vector<1x32xf32>
    %90 = vector.extract_strided_slice %88 {offsets = [0, 32], sizes = [1, 32], strides = [1, 1]} : vector<1x128xf32> to vector<1x32xf32>
    %91 = vector.extract_strided_slice %88 {offsets = [0, 64], sizes = [1, 32], strides = [1, 1]} : vector<1x128xf32> to vector<1x32xf32>
    %92 = vector.extract_strided_slice %88 {offsets = [0, 96], sizes = [1, 32], strides = [1, 1]} : vector<1x128xf32> to vector<1x32xf32>
    %93 = arith.mulf %90, %75 : vector<1x32xf32>
    %94 = arith.mulf %89, %91 : vector<1x32xf32>
    %95 = arith.addf %93, %94 : vector<1x32xf32>
    %96 = math.tanh %95 : vector<1x32xf32>
    %97 = arith.mulf %92, %96 : vector<1x32xf32>
    %c4_i32 = arith.constant 4 : i32
    %98 = arith.index_cast %c4_i32 : i32 to index
    %c0_26 = arith.constant 0 : index
    %99 = vector.load %arg5[%98, %c0_26] : memref<8x128xf32, #tpu.memory_space<vmem>>, vector<1x128xf32>
    %cst_27 = arith.constant dense<0.000000e+00> : vector<1x128xf32>
    %100 = tpu.matmul %97, %7, %cst_27 {dimension_numbers = #tpu.dot_dimension_numbers<[1], [0], [0], [1], [0, 0, 1, 1], [], []>} : vector<1x32xf32>, vector<32x128xf32>, vector<1x128xf32> -> vector<1x128xf32>
    %101 = arith.addf %99, %100 : vector<1x128xf32>
    %102 = math.tanh %101 : vector<1x128xf32>
    %103 = arith.negf %101 : vector<1x128xf32>
    %104 = math.exp %103 : vector<1x128xf32>
    %cst_28 = arith.constant 1.000000e+00 : f32
    %105 = vector.broadcast %cst_28 : f32 to vector<1x128xf32>
    %106 = arith.addf %105, %104 : vector<1x128xf32>
    %107 = arith.divf %105, %106 : vector<1x128xf32>
    %108 = arith.select %15, %102, %107 : vector<1x128xi1>, vector<1x128xf32>
    %109 = vector.extract_strided_slice %108 {offsets = [0, 0], sizes = [1, 32], strides = [1, 1]} : vector<1x128xf32> to vector<1x32xf32>
    %110 = vector.extract_strided_slice %108 {offsets = [0, 32], sizes = [1, 32], strides = [1, 1]} : vector<1x128xf32> to vector<1x32xf32>
    %111 = vector.extract_strided_slice %108 {offsets = [0, 64], sizes = [1, 32], strides = [1, 1]} : vector<1x128xf32> to vector<1x32xf32>
    %112 = vector.extract_strided_slice %108 {offsets = [0, 96], sizes = [1, 32], strides = [1, 1]} : vector<1x128xf32> to vector<1x32xf32>
    %113 = arith.mulf %110, %95 : vector<1x32xf32>
    %114 = arith.mulf %109, %111 : vector<1x32xf32>
    %115 = arith.addf %113, %114 : vector<1x32xf32>
    %116 = math.tanh %115 : vector<1x32xf32>
    %117 = arith.mulf %112, %116 : vector<1x32xf32>
    %c5_i32 = arith.constant 5 : i32
    %118 = arith.index_cast %c5_i32 : i32 to index
    %c0_29 = arith.constant 0 : index
    %119 = vector.load %arg5[%118, %c0_29] : memref<8x128xf32, #tpu.memory_space<vmem>>, vector<1x128xf32>
    %cst_30 = arith.constant dense<0.000000e+00> : vector<1x128xf32>
    %120 = tpu.matmul %117, %7, %cst_30 {dimension_numbers = #tpu.dot_dimension_numbers<[1], [0], [0], [1], [0, 0, 1, 1], [], []>} : vector<1x32xf32>, vector<32x128xf32>, vector<1x128xf32> -> vector<1x128xf32>
    %121 = arith.addf %119, %120 : vector<1x128xf32>
    %122 = math.tanh %121 : vector<1x128xf32>
    %123 = arith.negf %121 : vector<1x128xf32>
    %124 = math.exp %123 : vector<1x128xf32>
    %cst_31 = arith.constant 1.000000e+00 : f32
    %125 = vector.broadcast %cst_31 : f32 to vector<1x128xf32>
    %126 = arith.addf %125, %124 : vector<1x128xf32>
    %127 = arith.divf %125, %126 : vector<1x128xf32>
    %128 = arith.select %15, %122, %127 : vector<1x128xi1>, vector<1x128xf32>
    %129 = vector.extract_strided_slice %128 {offsets = [0, 0], sizes = [1, 32], strides = [1, 1]} : vector<1x128xf32> to vector<1x32xf32>
    %130 = vector.extract_strided_slice %128 {offsets = [0, 32], sizes = [1, 32], strides = [1, 1]} : vector<1x128xf32> to vector<1x32xf32>
    %131 = vector.extract_strided_slice %128 {offsets = [0, 64], sizes = [1, 32], strides = [1, 1]} : vector<1x128xf32> to vector<1x32xf32>
    %132 = vector.extract_strided_slice %128 {offsets = [0, 96], sizes = [1, 32], strides = [1, 1]} : vector<1x128xf32> to vector<1x32xf32>
    %133 = arith.mulf %130, %115 : vector<1x32xf32>
    %134 = arith.mulf %129, %131 : vector<1x32xf32>
    %135 = arith.addf %133, %134 : vector<1x32xf32>
    %136 = math.tanh %135 : vector<1x32xf32>
    %137 = arith.mulf %132, %136 : vector<1x32xf32>
    %c6_i32 = arith.constant 6 : i32
    %138 = arith.index_cast %c6_i32 : i32 to index
    %c0_32 = arith.constant 0 : index
    %139 = vector.load %arg5[%138, %c0_32] : memref<8x128xf32, #tpu.memory_space<vmem>>, vector<1x128xf32>
    %cst_33 = arith.constant dense<0.000000e+00> : vector<1x128xf32>
    %140 = tpu.matmul %137, %7, %cst_33 {dimension_numbers = #tpu.dot_dimension_numbers<[1], [0], [0], [1], [0, 0, 1, 1], [], []>} : vector<1x32xf32>, vector<32x128xf32>, vector<1x128xf32> -> vector<1x128xf32>
    %141 = arith.addf %139, %140 : vector<1x128xf32>
    %142 = math.tanh %141 : vector<1x128xf32>
    %143 = arith.negf %141 : vector<1x128xf32>
    %144 = math.exp %143 : vector<1x128xf32>
    %cst_34 = arith.constant 1.000000e+00 : f32
    %145 = vector.broadcast %cst_34 : f32 to vector<1x128xf32>
    %146 = arith.addf %145, %144 : vector<1x128xf32>
    %147 = arith.divf %145, %146 : vector<1x128xf32>
    %148 = arith.select %15, %142, %147 : vector<1x128xi1>, vector<1x128xf32>
    %149 = vector.extract_strided_slice %148 {offsets = [0, 0], sizes = [1, 32], strides = [1, 1]} : vector<1x128xf32> to vector<1x32xf32>
    %150 = vector.extract_strided_slice %148 {offsets = [0, 32], sizes = [1, 32], strides = [1, 1]} : vector<1x128xf32> to vector<1x32xf32>
    %151 = vector.extract_strided_slice %148 {offsets = [0, 64], sizes = [1, 32], strides = [1, 1]} : vector<1x128xf32> to vector<1x32xf32>
    %152 = vector.extract_strided_slice %148 {offsets = [0, 96], sizes = [1, 32], strides = [1, 1]} : vector<1x128xf32> to vector<1x32xf32>
    %153 = arith.mulf %150, %135 : vector<1x32xf32>
    %154 = arith.mulf %149, %151 : vector<1x32xf32>
    %155 = arith.addf %153, %154 : vector<1x32xf32>
    %156 = math.tanh %155 : vector<1x32xf32>
    %157 = arith.mulf %152, %156 : vector<1x32xf32>
    %c7_i32 = arith.constant 7 : i32
    %158 = arith.index_cast %c7_i32 : i32 to index
    %c0_35 = arith.constant 0 : index
    %159 = vector.load %arg5[%158, %c0_35] : memref<8x128xf32, #tpu.memory_space<vmem>>, vector<1x128xf32>
    %cst_36 = arith.constant dense<0.000000e+00> : vector<1x128xf32>
    %160 = tpu.matmul %157, %7, %cst_36 {dimension_numbers = #tpu.dot_dimension_numbers<[1], [0], [0], [1], [0, 0, 1, 1], [], []>} : vector<1x32xf32>, vector<32x128xf32>, vector<1x128xf32> -> vector<1x128xf32>
    %161 = arith.addf %159, %160 : vector<1x128xf32>
    %162 = math.tanh %161 : vector<1x128xf32>
    %163 = arith.negf %161 : vector<1x128xf32>
    %164 = math.exp %163 : vector<1x128xf32>
    %cst_37 = arith.constant 1.000000e+00 : f32
    %165 = vector.broadcast %cst_37 : f32 to vector<1x128xf32>
    %166 = arith.addf %165, %164 : vector<1x128xf32>
    %167 = arith.divf %165, %166 : vector<1x128xf32>
    %168 = arith.select %15, %162, %167 : vector<1x128xi1>, vector<1x128xf32>
    %169 = vector.extract_strided_slice %168 {offsets = [0, 0], sizes = [1, 32], strides = [1, 1]} : vector<1x128xf32> to vector<1x32xf32>
    %170 = vector.extract_strided_slice %168 {offsets = [0, 32], sizes = [1, 32], strides = [1, 1]} : vector<1x128xf32> to vector<1x32xf32>
    %171 = vector.extract_strided_slice %168 {offsets = [0, 64], sizes = [1, 32], strides = [1, 1]} : vector<1x128xf32> to vector<1x32xf32>
    %172 = vector.extract_strided_slice %168 {offsets = [0, 96], sizes = [1, 32], strides = [1, 1]} : vector<1x128xf32> to vector<1x32xf32>
    %173 = arith.mulf %170, %155 : vector<1x32xf32>
    %174 = arith.mulf %169, %171 : vector<1x32xf32>
    %175 = arith.addf %173, %174 : vector<1x32xf32>
    %176 = math.tanh %175 : vector<1x32xf32>
    %177 = arith.mulf %172, %176 : vector<1x32xf32>
    %c8_i32 = arith.constant 8 : i32
    %cst_38 = arith.constant dense<0.000000e+00> : vector<1x8xf32>
    %178 = tpu.matmul %177, %8, %cst_38 {dimension_numbers = #tpu.dot_dimension_numbers<[1], [0], [0], [1], [0, 0, 1, 1], [], []>} : vector<1x32xf32>, vector<32x8xf32>, vector<1x8xf32> -> vector<1x8xf32>
    %179 = arith.addf %178, %9 : vector<1x8xf32>
    %cst_39 = arith.constant dense<0xFF800000> : vector<1xf32>
    %180 = vector.multi_reduction <maximumf>, %179, %cst_39 [1] : vector<1x8xf32> to vector<1xf32>
    %181 = vector.shape_cast %180 : vector<1xf32> to vector<1x1xf32>
    %182 = vector.broadcast %181 : vector<1x1xf32> to vector<1x8xf32>
    %183 = arith.subf %179, %182 : vector<1x8xf32>
    %184 = math.exp %183 : vector<1x8xf32>
    %cst_40 = arith.constant dense<0.000000e+00> : vector<1xf32>
    %185 = vector.multi_reduction <add>, %184, %cst_40 [1] : vector<1x8xf32> to vector<1xf32>
    %186 = vector.shape_cast %185 : vector<1xf32> to vector<1x1xf32>
    %187 = math.log %186 : vector<1x1xf32>
    %188 = arith.addf %181, %187 : vector<1x1xf32>
    %189 = vector.broadcast %188 : vector<1x1xf32> to vector<1x8xf32>
    %190 = arith.subf %179, %189 : vector<1x8xf32>
    %c0_41 = arith.constant 0 : index
    %c0_42 = arith.constant 0 : index
    %191 = vector.load %arg4[%c0_41, %c0_42] : memref<1x8xf32, #tpu.memory_space<vmem>>, vector<1x8xf32>
    tpu.vector_store %arg4[%c0_41, %c0_42], %190 {strides = array<i32>} : memref<1x8xf32, #tpu.memory_space<vmem>>, vector<1x8xf32>,
    return
  }
}

</mosaic_0001>

<bundles_post_ra>
// kernel: tpu_custom_call.1
= control target key start
LH: loop header
LB: loop body
LE: loop exit
PB: predicated region body
PF: predicated region fallthrough
CT: control target
= control target key end

     0   :  { %9 = vsyncpa [#allocation4], 0  ;;  %s1002_s0 = inlined_call_operand.hbm [shape: f32[8,16], index: 0, kind: input, shape index: {}]   ;;  %s1003_s1 = inlined_call_operand.hbm [shape: f32[16,128], index: 1, kind: input, shape index: {}]   ;;  %s1004_s2 = inlined_call_operand.hbm [shape: f32[32,136], index: 2, kind: input, shape index: {}]   ;;  %s1005_s3 = inlined_call_operand.vmem [shape: f32[1,136], index: 3, kind: input, shape index: {}]   ;;  %s1006_s4 = inlined_call_operand.hbm [shape: f32[1,8], index: 4, kind: output, shape index: {}]  }
   0x1   :  { %10 = vsyncpa [#allocation7], 0  ;;  %s27_s17 = sshll.u32 %s1003_s1, 4  ;;  %s28_s17 = int_to_ptr.hbm [resolvable:$true] %s27_s17 }
   0x2   :  { %11 = vsyncpa [#allocation5], 0  ;;  %s885_s18 = smov [#allocation6]   ;;  %s17_s22 = sshll.u32 %s1002_s0, 4  ;;  %s18_s22 = int_to_ptr.hbm [resolvable:$true] %s17_s22 }
   0x3   :  { %s29_s19 = sshll.u32 %s885_s18, 4  ;;  %s886_s23 = smov 128   ;;  %s30_s19 = int_to_ptr.vmem [resolvable:$true] %s29_s19 }
   0x4   :  { %s887_s24 = smov 8   ;;  %s888_s25 = smov [#allocation3]  }
   0x5   :  { %35 = dma.hbm_to_vmem [thread:$0]  %s28_s17, 256, %s30_s19, [#allocation7], %s886_s23, %s886_s23, %s887_s24  }
   0x6   :  { %s19_s26 = sshll.u32 %s888_s25, 4  ;;  %s40_s29 = sshll.u32 %s1004_s2, 4  ;;  %s20_s26 = int_to_ptr.vmem [resolvable:$true] %s19_s26  ;;  %s41_s29 = int_to_ptr.hbm [resolvable:$true] %s40_s29 }
   0x7   :  { %22 = dma.hbm_to_vmem [thread:$0]  %s18_s22, 128, %s20_s26, [#allocation4]  }
   0x8   :  { %s889_s1 = smov [#allocation8]   ;;  %s890_s5 = smov 256  }
   0x9   :  { %s42_s30 = sshll.u32 %s889_s1, 4  ;;  %s891_s6 = smov 16   ;;  %s43_s30 = int_to_ptr.vmem [resolvable:$true] %s42_s30 }
   0xa   :  { %48 = dma.hbm_to_vmem [thread:$0]  %s41_s29, 1024, %s43_s30, [#allocation7], %s890_s5, %s890_s5, %s891_s6  }
   0xb   :  { %879 = dma.done.wait [#allocation4], 128  }
   0xc   :  { %880 = vsyncadd [#allocation4], 4294967168 }
   0xd   :  { %881 = dma.done.wait [#allocation7], 1280  }
   0xe   :  { %882 = vsyncadd [#allocation7], 4294966016  ;;  %v65_v0 = vld [vmem:[#allocation6 + $0x8] sm:$0xff]  ;;  %v64_v1 = vld [vmem:[#allocation6] sm:$0xff]  ;;  %vm70_vm0 = vcmask 130048   ;;  %v892_v7 = vmov 0.0   ;;  %v104_v17 = vlaneseq }
   0xf   :  { %88 = vmatpush.msra.mxu0 %v65_v0  ;;  %v63_v2 = vld [vmem:[#allocation3] sm:$0xff]  ;;  %v98_v3 = vld [vmem:[#allocation8 + $0x30] sm:$0xff]  ;;  %v97_v4 = vld [vmem:[#allocation8 + $0x20] sm:$0xff]  ;;  %s893_s7 = smov 64   ;;  %s894_s8 = smov 32   ;;  %vm110_vm8 = vcmask 261120  }
  0x10   :  { %126 = vmatpush.msra.mxu1 %v98_v3  ;;  %191 = vmatpush.msra.mxu2 %v98_v3  ;;  %v96_v5 = vld [vmem:[#allocation8 + $0x10] sm:$0xff]  ;;  %v95_v6 = vld [vmem:[#allocation8] sm:$0xff]  ;;  %v105_v19 = vand.u32 127, %v104_v17  ;;  %v99_v25 = vld [vmem:[#allocation8 + $0x8] sm:$0xff]  ;;  %s895_s11 = smov [#allocation9]   ;;  %s675_s14 = sshll.u32 %s1006_s4, 4  ;;  %s676_s14 = int_to_ptr.hbm [resolvable:$true] %s675_s14 }
  0x11   :  { %89 = vmatpush.msra.mxu0 %v64_v1  ;;  %256 = vmatpush.msra.mxu3 %v98_v3  ;;  %v714_v8 = vld [vmem:[%s1005_s3] ss:$0 sm:$0xff] }
  0x12   :  { %686 = vmatmul.msk.f32.vlgmr.msra.gmra.mxu0 %vm70_vm0, %v63_v2  ;;  %127 = vmatpush.msra.mxu1 %v97_v4  ;;  %vm106_vm1 = vcmp.ge.s32.totalorder %v105_v19, 64  ;;  %vm107_vm2 = vcmp.lt.s32.totalorder %v105_v19, 96 }
  0x13   :  { %192 = vmatpush.msra.mxu2 %v97_v4  ;;  %257 = vmatpush.msra.mxu3 %v97_v4  ;;  %vm933_vm4 = vmand %vm106_vm1, %vm107_vm2 }
  0x14   :  { %128 = vmatpush.msra.mxu1 %v96_v5  ;;  %321 = vmatpush.msrb.mxu0 %v98_v3 }
  0x15   :  { %193 = vmatpush.msra.mxu2 %v96_v5  ;;  %258 = vmatpush.msra.mxu3 %v96_v5 }
  0x16   :  { %129 = vmatpush.msra.mxu1 %v95_v6  ;;  %322 = vmatpush.msrb.mxu0 %v97_v4 }
  0x17   :  { %130 = vmatmul.f32.vlgmr.msra.gmra.mxu1 %v892_v7  ;;  %194 = vmatpush.msra.mxu2 %v95_v6 }
  0x18   :  { %259 = vmatpush.msra.mxu3 %v95_v6  ;;  %323 = vmatpush.msrb.mxu0 %v96_v5 }
  0x19   :  { %386 = vmatpush.msrb.mxu1 %v98_v3  ;;  %451 = vmatpush.msrb.mxu2 %v98_v3 }
  0x1a   :  { %324 = vmatpush.msrb.mxu0 %v95_v6  ;;  %516 = vmatpush.msrb.mxu3 %v98_v3 }
  0x1b   :  { %387 = vmatpush.msrb.mxu1 %v97_v4  ;;  %452 = vmatpush.msrb.mxu2 %v97_v4 }
  0x1c   :  { %517 = vmatpush.msrb.mxu3 %v97_v4  ;;  %581 = vmatpush.msra.mxu0 %v98_v3 }
  0x1d   :  { %388 = vmatpush.msrb.mxu1 %v96_v5  ;;  %453 = vmatpush.msrb.mxu2 %v96_v5 }
  0x1e   :  { %518 = vmatpush.msrb.mxu3 %v96_v5  ;;  %582 = vmatpush.msra.mxu0 %v97_v4 }
  0x1f   :  { %389 = vmatpush.msrb.mxu1 %v95_v6  ;;  %454 = vmatpush.msrb.mxu2 %v95_v6 }
  0x20   :  { %519 = vmatpush.msrb.mxu3 %v95_v6  ;;  %583 = vmatpush.msra.mxu0 %v96_v5 }
  0x22   :  { %584 = vmatpush.msra.mxu0 %v95_v6 }
  0x8f   :  { %v91_v9 = vpop.f32.mrf.mxu0 }
  0x90   :  { %v92_v10 = vadd.f32 %v714_v8, %v91_v9 }
  0x92   :  { %94 = vst [vmem:[#allocation2] sm:$0xff] %v92_v10 }
  0x94   :  { %v131_v11 = vpop.f32.mrf.mxu1 }
  0x99   :  { %v109_v12 = vld [vmem:[#allocation2] sm:$0x1]  ;;  %v173_v41 = vld [vmem:[#allocation2 + $0x1] sm:$0x1]  ;;  %v238_v4 = vld [vmem:[#allocation2 + $0x2] sm:$0x1] }
  0x9a   :  { %v134_v13 = vadd.f32 %v131_v11, %v109_v12 }
  0x9c   :  { %v687_v14 = vmul.f32 -1.442695, %v134_v13 }
  0x9e   :  { %715 = vpow2.f32 %v687_v14 }
  0xa4   :  { %v716_v15 = vpop.eup %715 }
  0xa5   :  { %v139_v16 = vadd.f32 1.0, %v716_v15 }
  0xa7   :  { %717 = vrcp.f32 %v139_v16  ;;  %v151_v22 = vand.u32 2147483648, %v139_v16  ;;  %v149_v24 = vand.u32 2147483647, %v139_v16  ;;  %vm145_vm5 = vweird.f32 %v139_v16 }
  0xa8   :  { %719 = vtanh.f32 %v134_v13 }
  0xa9   :  { %v152_v27 = vor.u32 1.1754944e-38, %v151_v22  ;;  %vm150_vm7 = vcmp.eq.f32.partialorder %v149_v24, 8.507059e+37 }
  0xad   :  { %v718_v18 = vpop.eup %717 }
  0xae   :  { %v141_v20 = vmul.f32 %v718_v18, %v139_v16  ;;  %vm146_vm3 = vweird.f32 %v718_v18  ;;  %v720_v29 = vpop.eup %719 }
  0xaf   :  { %vm147_vm6 = vmor %vm145_vm5, %vm146_vm3 }
  0xb0   :  { %v142_v21 = vsub.f32 1.0, %v141_v20 }
  0xb2   :  { %v143_v23 = vmul.f32 %v718_v18, %v142_v21 }
  0xb4   :  { %v144_v26 = vadd.f32 %v718_v18, %v143_v23 }
  0xb6   :  { %v148_v28 = vsel %vm147_vm6, %v718_v18, %v144_v26 }
  0xb7   :  { %v153_v30 = vsel %vm150_vm7, %v152_v27, %v148_v28 }
  0xb8   :  { %v155_v31 = vsel %vm933_vm4, %v720_v29, %v153_v30 }
  0xb9   :  { %158 = vrot.lane.b32.xlu0 %v155_v31, %s893_s7  ;;  %v156_v34 = vmul.f32 0.0, %v155_v31 }
 0x12b   :  { %v159_v32 = vpop.permute.xlu0 %158 }
 0x12c   :  { %v161_v33 = vmul.f32 %v159_v32, %v155_v31  ;;  %v303_v32 = vld [vmem:[#allocation2 + $0x3] sm:$0x1] }
 0x12e   :  { %163 = vrot.lane.b32.xlu0 %v161_v33, %s894_s8 }
 0x1a0   :  { %v164_v35 = vpop.permute.xlu0 %163 }
 0x1a1   :  { %v166_v36 = vadd.f32 %v164_v35, %v156_v34 }
 0x1a3   :  { %721 = vtanh.f32 %v166_v36 }
 0x1a9   :  { %v722_v37 = vpop.eup %721 }
 0x1aa   :  { %169 = vrot.lane.b32.xlu1 %v722_v37, %s893_s7 }
 0x21c   :  { %v170_v38 = vpop.permute.xlu1 %169 }
 0x21d   :  { %v172_v39 = vmul.f32 %v170_v38, %v155_v31 }
 0x21f   :  { %175 = vrot.lane.b32.xlu1 %v172_v39, %s894_s8 }
 0x291   :  { %v176_v40 = vpop.permute.xlu1 %175 }
 0x292   :  { %688 = vmatmul.msk.f32.vlgmr.msra.gmra.mxu2 %vm110_vm8, %v176_v40 }
 0x315   :  { %v196_v42 = vpop.f32.mrf.mxu2 }
 0x316   :  { %v199_v43 = vadd.f32 %v196_v42, %v173_v41 }
 0x318   :  { %v689_v44 = vmul.f32 -1.442695, %v199_v43 }
 0x31a   :  { %723 = vpow2.f32 %v689_v44 }
 0x320   :  { %v724_v45 = vpop.eup %723 }
 0x321   :  { %v204_v46 = vadd.f32 1.0, %v724_v45 }
 0x323   :  { %725 = vrcp.f32 %v204_v46  ;;  %v216_v50 = vand.u32 2147483648, %v204_v46  ;;  %v214_v52 = vand.u32 2147483647, %v204_v46  ;;  %vm210_vm10 = vweird.f32 %v204_v46 }
 0x324   :  { %727 = vtanh.f32 %v199_v43 }
 0x325   :  { %v217_v54 = vor.u32 1.1754944e-38, %v216_v50  ;;  %vm215_vm12 = vcmp.eq.f32.partialorder %v214_v52, 8.507059e+37 }
 0x329   :  { %v726_v47 = vpop.eup %725 }
 0x32a   :  { %v206_v48 = vmul.f32 %v726_v47, %v204_v46  ;;  %vm211_vm9 = vweird.f32 %v726_v47  ;;  %v728_v56 = vpop.eup %727 }
 0x32b   :  { %vm212_vm11 = vmor %vm210_vm10, %vm211_vm9 }
 0x32c   :  { %v207_v49 = vsub.f32 1.0, %v206_v48 }
 0x32e   :  { %v208_v51 = vmul.f32 %v726_v47, %v207_v49 }
 0x330   :  { %v209_v53 = vadd.f32 %v726_v47, %v208_v51 }
 0x332   :  { %v213_v55 = vsel %vm212_vm11, %v726_v47, %v209_v53 }
 0x333   :  { %v218_v57 = vsel %vm215_vm12, %v217_v54, %v213_v55 }
 0x334   :  { %v220_v58 = vsel %vm933_vm4, %v728_v56, %v218_v57 }
 0x335   :  { %223 = vrot.lane.b32.xlu2 %v220_v58, %s893_s7  ;;  %v221_v61 = vmul.f32 %v220_v58, %v166_v36 }
 0x38f   :  { %v224_v59 = vpop.permute.xlu2 %223 }
 0x390   :  { %v226_v60 = vmul.f32 %v224_v59, %v220_v58  ;;  %v368_v59 = vld [vmem:[#allocation2 + $0x4] sm:$0x1] }
 0x392   :  { %228 = vrot.lane.b32.xlu2 %v226_v60, %s894_s8 }
 0x3ec   :  { %v229_v62 = vpop.permute.xlu2 %228 }
 0x3ed   :  { %v231_v63 = vadd.f32 %v229_v62, %v221_v61 }
 0x3ef   :  { %729 = vtanh.f32 %v231_v63 }
 0x3f5   :  { %v730_v0 = vpop.eup %729 }
 0x3f6   :  { %234 = vrot.lane.b32.xlu0 %v730_v0, %s893_s7 }
 0x468   :  { %v235_v1 = vpop.permute.xlu0 %234 }
 0x469   :  { %v237_v2 = vmul.f32 %v235_v1, %v220_v58 }
 0x46b   :  { %240 = vrot.lane.b32.xlu1 %v237_v2, %s894_s8 }
 0x4dd   :  { %v241_v3 = vpop.permute.xlu1 %240 }
 0x4de   :  { %690 = vmatmul.msk.f32.vlgmr.msra.gmra.mxu3 %vm110_vm8, %v241_v3 }
 0x561   :  { %v261_v5 = vpop.f32.mrf.mxu3 }
 0x562   :  { %v264_v6 = vadd.f32 %v261_v5, %v238_v4 }
 0x564   :  { %v691_v7 = vmul.f32 -1.442695, %v264_v6 }
 0x566   :  { %731 = vpow2.f32 %v691_v7 }
 0x56c   :  { %v732_v8 = vpop.eup %731 }
 0x56d   :  { %v269_v9 = vadd.f32 1.0, %v732_v8 }
 0x56f   :  { %733 = vrcp.f32 %v269_v9  ;;  %v281_v13 = vand.u32 2147483648, %v269_v9  ;;  %v279_v15 = vand.u32 2147483647, %v269_v9  ;;  %vm275_vm14 = vweird.f32 %v269_v9 }
 0x570   :  { %735 = vtanh.f32 %v264_v6 }
 0x571   :  { %v282_v17 = vor.u32 1.1754944e-38, %v281_v13  ;;  %vm280_vm0 = vcmp.eq.f32.partialorder %v279_v15, 8.507059e+37 }
 0x575   :  { %v734_v10 = vpop.eup %733 }
 0x576   :  { %v271_v11 = vmul.f32 %v734_v10, %v269_v9  ;;  %vm276_vm13 = vweird.f32 %v734_v10  ;;  %v736_v19 = vpop.eup %735 }
 0x577   :  { %vm277_vm15 = vmor %vm275_vm14, %vm276_vm13 }
 0x578   :  { %v272_v12 = vsub.f32 1.0, %v271_v11 }
 0x57a   :  { %v273_v14 = vmul.f32 %v734_v10, %v272_v12 }
 0x57c   :  { %v274_v16 = vadd.f32 %v734_v10, %v273_v14 }
 0x57e   :  { %v278_v18 = vsel %vm277_vm15, %v734_v10, %v274_v16 }
 0x57f   :  { %v283_v20 = vsel %vm280_vm0, %v282_v17, %v278_v18 }
 0x580   :  { %v285_v21 = vsel %vm933_vm4, %v736_v19, %v283_v20 }
 0x581   :  { %288 = vrot.lane.b32.xlu2 %v285_v21, %s893_s7  ;;  %v286_v24 = vmul.f32 %v285_v21, %v231_v63 }
 0x5db   :  { %v289_v22 = vpop.permute.xlu2 %288 }
 0x5dc   :  { %v291_v23 = vmul.f32 %v289_v22, %v285_v21  ;;  %v433_v22 = vld [vmem:[#allocation2 + $0x5] sm:$0x1] }
 0x5de   :  { %293 = vrot.lane.b32.xlu0 %v291_v23, %s894_s8 }
 0x650   :  { %v294_v26 = vpop.permute.xlu0 %293 }
 0x651   :  { %v296_v27 = vadd.f32 %v294_v26, %v286_v24 }
 0x653   :  { %737 = vtanh.f32 %v296_v27 }
 0x659   :  { %v738_v28 = vpop.eup %737 }
 0x65a   :  { %299 = vrot.lane.b32.xlu1 %v738_v28, %s893_s7 }
 0x6cc   :  { %v300_v29 = vpop.permute.xlu1 %299 }
 0x6cd   :  { %v302_v30 = vmul.f32 %v300_v29, %v285_v21 }
 0x6cf   :  { %305 = vrot.lane.b32.xlu2 %v302_v30, %s894_s8 }
 0x729   :  { %v306_v31 = vpop.permute.xlu2 %305 }
 0x72a   :  { %692 = vmatmul.msk.f32.vlgmr.msrb.gmra.mxu0 %vm110_vm8, %v306_v31 }
 0x7a7   :  { %v326_v33 = vpop.f32.mrf.mxu0 }
 0x7a8   :  { %v329_v34 = vadd.f32 %v326_v33, %v303_v32 }
 0x7aa   :  { %v693_v35 = vmul.f32 -1.442695, %v329_v34 }
 0x7ac   :  { %739 = vpow2.f32 %v693_v35 }
 0x7b2   :  { %v740_v36 = vpop.eup %739 }
 0x7b3   :  { %v334_v37 = vadd.f32 1.0, %v740_v36 }
 0x7b5   :  { %741 = vrcp.f32 %v334_v37  ;;  %v346_v41 = vand.u32 2147483648, %v334_v37  ;;  %v344_v43 = vand.u32 2147483647, %v334_v37  ;;  %vm340_vm2 = vweird.f32 %v334_v37 }
 0x7b6   :  { %743 = vtanh.f32 %v329_v34 }
 0x7b7   :  { %v347_v45 = vor.u32 1.1754944e-38, %v346_v41  ;;  %vm345_vm5 = vcmp.eq.f32.partialorder %v344_v43, 8.507059e+37 }
 0x7bb   :  { %v742_v38 = vpop.eup %741 }
 0x7bc   :  { %v336_v39 = vmul.f32 %v742_v38, %v334_v37  ;;  %vm341_vm1 = vweird.f32 %v742_v38  ;;  %v744_v47 = vpop.eup %743 }
 0x7bd   :  { %vm342_vm3 = vmor %vm340_vm2, %vm341_vm1 }
 0x7be   :  { %v337_v40 = vsub.f32 1.0, %v336_v39 }
 0x7c0   :  { %v338_v42 = vmul.f32 %v742_v38, %v337_v40 }
 0x7c2   :  { %v339_v44 = vadd.f32 %v742_v38, %v338_v42 }
 0x7c4   :  { %v343_v46 = vsel %vm342_vm3, %v742_v38, %v339_v44 }
 0x7c5   :  { %v348_v48 = vsel %vm345_vm5, %v347_v45, %v343_v46 }
 0x7c6   :  { %v350_v49 = vsel %vm933_vm4, %v744_v47, %v348_v48 }
 0x7c7   :  { %353 = vrot.lane.b32.xlu0 %v350_v49, %s893_s7  ;;  %v351_v52 = vmul.f32 %v350_v49, %v296_v27 }
 0x839   :  { %v354_v50 = vpop.permute.xlu0 %353 }
 0x83a   :  { %v356_v51 = vmul.f32 %v354_v50, %v350_v49  ;;  %v498_v50 = vld [vmem:[#allocation2 + $0x6] sm:$0x1] }
 0x83c   :  { %358 = vrot.lane.b32.xlu1 %v356_v51, %s894_s8 }
 0x8ae   :  { %v359_v53 = vpop.permute.xlu1 %358 }
 0x8af   :  { %v361_v54 = vadd.f32 %v359_v53, %v351_v52 }
 0x8b1   :  { %745 = vtanh.f32 %v361_v54 }
 0x8b7   :  { %v746_v55 = vpop.eup %745 }
 0x8b8   :  { %364 = vrot.lane.b32.xlu2 %v746_v55, %s893_s7 }
 0x912   :  { %v365_v56 = vpop.permute.xlu2 %364 }
 0x913   :  { %v367_v57 = vmul.f32 %v365_v56, %v350_v49 }
 0x915   :  { %370 = vrot.lane.b32.xlu0 %v367_v57, %s894_s8 }
 0x987   :  { %v371_v58 = vpop.permute.xlu0 %370 }
 0x988   :  { %694 = vmatmul.msk.f32.vlgmr.msrb.gmra.mxu1 %vm110_vm8, %v371_v58 }
 0xa05   :  { %v391_v60 = vpop.f32.mrf.mxu1 }
 0xa06   :  { %v394_v61 = vadd.f32 %v391_v60, %v368_v59 }
 0xa08   :  { %v695_v62 = vmul.f32 -1.442695, %v394_v61 }
 0xa0a   :  { %747 = vpow2.f32 %v695_v62 }
 0xa10   :  { %v748_v63 = vpop.eup %747 }
 0xa11   :  { %v399_v0 = vadd.f32 1.0, %v748_v63 }
 0xa13   :  { %749 = vrcp.f32 %v399_v0  ;;  %v411_v4 = vand.u32 2147483648, %v399_v0  ;;  %v409_v6 = vand.u32 2147483647, %v399_v0  ;;  %vm405_vm7 = vweird.f32 %v399_v0 }
 0xa14   :  { %751 = vtanh.f32 %v394_v61 }
 0xa15   :  { %v412_v8 = vor.u32 1.1754944e-38, %v411_v4  ;;  %vm410_vm10 = vcmp.eq.f32.partialorder %v409_v6, 8.507059e+37 }
 0xa19   :  { %v750_v1 = vpop.eup %749 }
 0xa1a   :  { %v401_v2 = vmul.f32 %v750_v1, %v399_v0  ;;  %vm406_vm6 = vweird.f32 %v750_v1  ;;  %v752_v10 = vpop.eup %751 }
 0xa1b   :  { %vm407_vm9 = vmor %vm405_vm7, %vm406_vm6 }
 0xa1c   :  { %v402_v3 = vsub.f32 1.0, %v401_v2 }
 0xa1e   :  { %v403_v5 = vmul.f32 %v750_v1, %v402_v3 }
 0xa20   :  { %v404_v7 = vadd.f32 %v750_v1, %v403_v5 }
 0xa22   :  { %v408_v9 = vsel %vm407_vm9, %v750_v1, %v404_v7 }
 0xa23   :  { %v413_v11 = vsel %vm410_vm10, %v412_v8, %v408_v9 }
 0xa24   :  { %v415_v12 = vsel %vm933_vm4, %v752_v10, %v413_v11 }
 0xa25   :  { %418 = vrot.lane.b32.xlu1 %v415_v12, %s893_s7  ;;  %v416_v15 = vmul.f32 %v415_v12, %v361_v54 }
 0xa97   :  { %v419_v13 = vpop.permute.xlu1 %418 }
 0xa98   :  { %v421_v14 = vmul.f32 %v419_v13, %v415_v12  ;;  %v563_v13 = vld [vmem:[#allocation2 + $0x7] sm:$0x1] }
 0xa9a   :  { %423 = vrot.lane.b32.xlu2 %v421_v14, %s894_s8 }
 0xaf4   :  { %v424_v16 = vpop.permute.xlu2 %423 }
 0xaf5   :  { %v426_v17 = vadd.f32 %v424_v16, %v416_v15 }
 0xaf7   :  { %753 = vtanh.f32 %v426_v17 }
 0xafd   :  { %v754_v18 = vpop.eup %753 }
 0xafe   :  { %429 = vrot.lane.b32.xlu0 %v754_v18, %s893_s7 }
 0xb70   :  { %v430_v19 = vpop.permute.xlu0 %429 }
 0xb71   :  { %v432_v20 = vmul.f32 %v430_v19, %v415_v12 }
 0xb73   :  { %435 = vrot.lane.b32.xlu1 %v432_v20, %s894_s8 }
 0xbe5   :  { %v436_v21 = vpop.permute.xlu1 %435 }
 0xbe6   :  { %696 = vmatmul.msk.f32.vlgmr.msrb.gmra.mxu2 %vm110_vm8, %v436_v21 }
 0xc69   :  { %v456_v23 = vpop.f32.mrf.mxu2 }
 0xc6a   :  { %v459_v24 = vadd.f32 %v456_v23, %v433_v22 }
 0xc6c   :  { %v697_v26 = vmul.f32 -1.442695, %v459_v24 }
 0xc6e   :  { %755 = vpow2.f32 %v697_v26 }
 0xc74   :  { %v756_v27 = vpop.eup %755 }
 0xc75   :  { %v464_v28 = vadd.f32 1.0, %v756_v27 }
 0xc77   :  { %757 = vrcp.f32 %v464_v28  ;;  %v476_v32 = vand.u32 2147483648, %v464_v28  ;;  %v474_v34 = vand.u32 2147483647, %v464_v28  ;;  %vm470_vm12 = vweird.f32 %v464_v28 }
 0xc78   :  { %759 = vtanh.f32 %v459_v24 }
 0xc79   :  { %v477_v36 = vor.u32 1.1754944e-38, %v476_v32  ;;  %vm475_vm14 = vcmp.eq.f32.partialorder %v474_v34, 8.507059e+37 }
 0xc7d   :  { %v758_v29 = vpop.eup %757 }
 0xc7e   :  { %v466_v30 = vmul.f32 %v758_v29, %v464_v28  ;;  %vm471_vm11 = vweird.f32 %v758_v29  ;;  %v760_v38 = vpop.eup %759 }
 0xc7f   :  { %vm472_vm13 = vmor %vm470_vm12, %vm471_vm11 }
 0xc80   :  { %v467_v31 = vsub.f32 1.0, %v466_v30 }
 0xc82   :  { %v468_v33 = vmul.f32 %v758_v29, %v467_v31 }
 0xc84   :  { %v469_v35 = vadd.f32 %v758_v29, %v468_v33 }
 0xc86   :  { %v473_v37 = vsel %vm472_vm13, %v758_v29, %v469_v35 }
 0xc87   :  { %v478_v39 = vsel %vm475_vm14, %v477_v36, %v473_v37 }
 0xc88   :  { %v480_v40 = vsel %vm933_vm4, %v760_v38, %v478_v39  ;;  %v102_v38 = vld [vmem:[#allocation8 + $0x38] sm:$0xff]  ;;  %v101_v39 = vld [vmem:[#allocation8 + $0x28] sm:$0xff] }
 0xc89   :  { %483 = vrot.lane.b32.xlu2 %v480_v40, %s893_s7  ;;  %v481_v43 = vmul.f32 %v480_v40, %v426_v17  ;;  %645 = vmatpush.msra.mxu1 %v102_v38 }
 0xc8b   :  { %646 = vmatpush.msra.mxu1 %v101_v39 }
 0xce3   :  { %v484_v41 = vpop.permute.xlu2 %483 }
 0xce4   :  { %v486_v42 = vmul.f32 %v484_v41, %v480_v40 }
 0xce6   :  { %488 = vrot.lane.b32.xlu0 %v486_v42, %s894_s8 }
 0xd58   :  { %v489_v44 = vpop.permute.xlu0 %488 }
 0xd59   :  { %v491_v45 = vadd.f32 %v489_v44, %v481_v43  ;;  %v103_v44 = vld [vmem:[%s1005_s3 + $0x1] sm:$0x1]  ;;  %s673_s3 = sshll.u32 %s895_s11, 4  ;;  %s674_s3 = int_to_ptr.vmem [resolvable:$true] %s673_s3 }
 0xd5b   :  { %761 = vtanh.f32 %v491_v45 }
 0xd61   :  { %v762_v46 = vpop.eup %761 }
 0xd62   :  { %494 = vrot.lane.b32.xlu1 %v762_v46, %s893_s7 }
 0xdd4   :  { %v495_v47 = vpop.permute.xlu1 %494 }
 0xdd5   :  { %v497_v48 = vmul.f32 %v495_v47, %v480_v40  ;;  %v100_v40 = vld [vmem:[#allocation8 + $0x18] sm:$0xff] }
 0xdd6   :  { %647 = vmatpush.msra.mxu1 %v100_v40 }
 0xdd7   :  { %500 = vrot.lane.b32.xlu2 %v497_v48, %s894_s8 }
 0xdd8   :  { %648 = vmatpush.msra.mxu1 %v99_v25 }
 0xe31   :  { %v501_v49 = vpop.permute.xlu2 %500 }
 0xe32   :  { %698 = vmatmul.msk.f32.vlgmr.msrb.gmra.mxu3 %vm110_vm8, %v501_v49 }
 0xeb5   :  { %v521_v51 = vpop.f32.mrf.mxu3 }
 0xeb6   :  { %v524_v52 = vadd.f32 %v521_v51, %v498_v50 }
 0xeb8   :  { %v699_v53 = vmul.f32 -1.442695, %v524_v52 }
 0xeba   :  { %763 = vpow2.f32 %v699_v53 }
 0xec0   :  { %v764_v54 = vpop.eup %763 }
 0xec1   :  { %v529_v55 = vadd.f32 1.0, %v764_v54 }
 0xec3   :  { %765 = vrcp.f32 %v529_v55  ;;  %v541_v59 = vand.u32 2147483648, %v529_v55  ;;  %v539_v61 = vand.u32 2147483647, %v529_v55  ;;  %vm535_vm0 = vweird.f32 %v529_v55 }
 0xec4   :  { %767 = vtanh.f32 %v524_v52 }
 0xec5   :  { %v542_v63 = vor.u32 1.1754944e-38, %v541_v59  ;;  %vm540_vm2 = vcmp.eq.f32.partialorder %v539_v61, 8.507059e+37 }
 0xec9   :  { %v766_v56 = vpop.eup %765 }
 0xeca   :  { %v531_v57 = vmul.f32 %v766_v56, %v529_v55  ;;  %vm536_vm15 = vweird.f32 %v766_v56  ;;  %v768_v1 = vpop.eup %767 }
 0xecb   :  { %vm537_vm1 = vmor %vm535_vm0, %vm536_vm15 }
 0xecc   :  { %v532_v58 = vsub.f32 1.0, %v531_v57 }
 0xece   :  { %v533_v60 = vmul.f32 %v766_v56, %v532_v58 }
 0xed0   :  { %v534_v62 = vadd.f32 %v766_v56, %v533_v60 }
 0xed2   :  { %v538_v0 = vsel %vm537_vm1, %v766_v56, %v534_v62 }
 0xed3   :  { %v543_v2 = vsel %vm540_vm2, %v542_v63, %v538_v0 }
 0xed4   :  { %v545_v3 = vsel %vm933_vm4, %v768_v1, %v543_v2 }
 0xed5   :  { %548 = vrot.lane.b32.xlu0 %v545_v3, %s893_s7  ;;  %v546_v6 = vmul.f32 %v545_v3, %v491_v45 }
 0xf47   :  { %v549_v4 = vpop.permute.xlu0 %548 }
 0xf48   :  { %v551_v5 = vmul.f32 %v549_v4, %v545_v3 }
 0xf4a   :  { %553 = vrot.lane.b32.xlu1 %v551_v5, %s894_s8 }
 0xfbc   :  { %v554_v7 = vpop.permute.xlu1 %553 }
 0xfbd   :  { %v556_v8 = vadd.f32 %v554_v7, %v546_v6 }
 0xfbf   :  { %769 = vtanh.f32 %v556_v8 }
 0xfc5   :  { %v770_v9 = vpop.eup %769 }
 0xfc6   :  { %559 = vrot.lane.b32.xlu2 %v770_v9, %s893_s7 }
0x1020   :  { %v560_v10 = vpop.permute.xlu2 %559 }
0x1021   :  { %v562_v11 = vmul.f32 %v560_v10, %v545_v3 }
0x1023   :  { %565 = vrot.lane.b32.xlu0 %v562_v11, %s894_s8 }
0x1095   :  { %v566_v12 = vpop.permute.xlu0 %565 }
0x1096   :  { %700 = vmatmul.msk.f32.vlgmr.msra.gmra.mxu0 %vm110_vm8, %v566_v12 }
0x1113   :  { %v586_v14 = vpop.f32.mrf.mxu0 }
0x1114   :  { %v589_v15 = vadd.f32 %v586_v14, %v563_v13 }
0x1116   :  { %v701_v16 = vmul.f32 -1.442695, %v589_v15 }
0x1118   :  { %771 = vpow2.f32 %v701_v16 }
0x111e   :  { %v772_v17 = vpop.eup %771 }
0x111f   :  { %v594_v18 = vadd.f32 1.0, %v772_v17 }
0x1121   :  { %773 = vrcp.f32 %v594_v18  ;;  %v606_v22 = vand.u32 2147483648, %v594_v18  ;;  %v604_v24 = vand.u32 2147483647, %v594_v18  ;;  %vm600_vm5 = vweird.f32 %v594_v18 }
0x1122   :  { %775 = vtanh.f32 %v589_v15 }
0x1123   :  { %v607_v27 = vor.u32 1.1754944e-38, %v606_v22  ;;  %vm605_vm7 = vcmp.eq.f32.partialorder %v604_v24, 8.507059e+37 }
0x1127   :  { %v774_v19 = vpop.eup %773 }
0x1128   :  { %v596_v20 = vmul.f32 %v774_v19, %v594_v18  ;;  %vm601_vm3 = vweird.f32 %v774_v19  ;;  %v776_v29 = vpop.eup %775 }
0x1129   :  { %vm602_vm6 = vmor %vm600_vm5, %vm601_vm3 }
0x112a   :  { %v597_v21 = vsub.f32 1.0, %v596_v20 }
0x112c   :  { %v598_v23 = vmul.f32 %v774_v19, %v597_v21 }
0x112e   :  { %v599_v26 = vadd.f32 %v774_v19, %v598_v23 }
0x1130   :  { %v603_v28 = vsel %vm602_vm6, %v774_v19, %v599_v26 }
0x1131   :  { %v608_v30 = vsel %vm605_vm7, %v607_v27, %v603_v28 }
0x1132   :  { %v610_v31 = vsel %vm933_vm4, %v776_v29, %v608_v30  ;;  %vm653_vm4 = vcmask 57344  }
0x1133   :  { %613 = vrot.lane.b32.xlu1 %v610_v31, %s893_s7  ;;  %v611_v34 = vmul.f32 %v610_v31, %v556_v8 }
0x11a5   :  { %v614_v32 = vpop.permute.xlu1 %613 }
0x11a6   :  { %v616_v33 = vmul.f32 %v614_v32, %v610_v31 }
0x11a8   :  { %618 = vrot.lane.b32.xlu2 %v616_v33, %s894_s8 }
0x1202   :  { %v619_v35 = vpop.permute.xlu2 %618 }
0x1203   :  { %v621_v36 = vadd.f32 %v619_v35, %v611_v34 }
0x1205   :  { %777 = vtanh.f32 %v621_v36 }
0x120b   :  { %v778_v37 = vpop.eup %777 }
0x120c   :  { %624 = vrot.lane.b32.xlu0 %v778_v37, %s893_s7 }
0x127e   :  { %v625_v41 = vpop.permute.xlu0 %624 }
0x127f   :  { %v627_v42 = vmul.f32 %v625_v41, %v610_v31 }
0x1281   :  { %629 = vrot.lane.b32.xlu1 %v627_v42, %s894_s8 }
0x12f3   :  { %v630_v43 = vpop.permute.xlu1 %629 }
0x12f4   :  { %702 = vmatmul.msk.f32.vlgmr.msra.gmra.mxu1 %vm110_vm8, %v630_v43 }
0x1371   :  { %v650_v45 = vpop.f32.mrf.mxu1 }
0x1372   :  { %v651_v46 = vadd.f32 %v650_v45, %v103_v44 }
0x1374   :  { %v654_v47 = vsel %vm653_vm4, %v651_v46, -inf }
0x1375   :  { %655 = vmax.xlane.f32.xlu2 %v654_v47 }
0x13e8   :  { %v656_v48 = vpop.xlane.xlu2 %655 }
0x13e9   :  { %v657_v49 = vsub.f32 %v651_v46, %v656_v48 }
0x13eb   :  { %v658_v50 = vmul.f32 1.442695, %v657_v49 }
0x13ed   :  { %779 = vpow2.f32 %v658_v50 }
0x13f3   :  { %v780_v51 = vpop.eup %779 }
0x13f4   :  { %v660_v52 = vsel %vm653_vm4, %v780_v51, 0.0 }
0x13f5   :  { %661 = vadd.xlane.f32.xlu0 %v660_v52 }
0x1468   :  { %v662_v53 = vpop.xlane.xlu0 %661 }
0x1469   :  { %781 = vlog2.f32 %v662_v53 }
0x146f   :  { %v782_v54 = vpop.eup %781 }
0x1470   :  { %v664_v55 = vmul.f32 0.6931472, %v782_v54 }
0x1472   :  { %v665_v56 = vadd.f32 %v664_v55, %v656_v48 }
0x1474   :  { %v666_v57 = vsub.f32 %v651_v46, %v665_v56 }
0x1476   :  { %667 = vst.msk [vmem:[#allocation9] sm:$0x1] %vm653_vm4, %v666_v57 }
0x1477   :  { %678 = dma.vmem_to_hbm [thread:$0]  %s674_s3, 16, %s676_s14, [#allocation5]  }
0x1478   :  { %883 = dma.done.wait [#allocation5], 16  }
0x1479   :  { %884 = vsyncadd [#allocation5], 4294967280 }
0x147a   :  { %683 = vsyncpa [#allocation4], 1 }
0x147b   :  { %684 = vsyncpa [#allocation7], 1 }
0x147c   :  { %685 = vsyncpa [#allocation5], 1 }

</bundles_post_ra>
